<compile_context>
chip_gen: v6e
topology: v6e:2x2x1
jax: 0.10.0
libtpu: 0.0.40
codegen_flags: <defaults>
</compile_context>

<pallas_src>
import math
import functools

import jax
import jax.numpy as jnp
from jax.experimental import pallas as pl
from jax.experimental.pallas import tpu as pltpu


def _csk_kernel(
    q_ref,       # (Bt, 1, d)    precomputed query (unscaled)
    hv_ref,      # (Bt, S, D)    hidden_vectors
    csk_ref,     # (Bt, 2S, D)   stacked [intra_csk ; inter_csk] per batch
    im_ref,      # (Bt, S, 1)    intra_mask (transposed)
    em_ref,      # (Bt, S, 1)    inter_mask (transposed)
    wkv_ref,     # (D, 2d)       fused key|value weight
    bkv_ref,     # (1, 2d)       combined biases (bk+bw | bv+bw)
    ww_ref,      # (D, d)        csk projection weight (bias folded into bkv)
    out_ref,     # (Bt, S, d)    final_features
    probs_ref,   # (Bt, S, 1)    attention_probs (transposed; wrapper swaps back)
    *, hidden_features,
):
    f32 = jnp.float32
    d = hidden_features
    Bt, S, D = hv_ref.shape
    scale = f32(1.0 / math.sqrt(d))

    q3 = q_ref[...]                      # (Bt, 1, d)  unscaled (output path)
    q_s = q3 * scale                     # 1/sqrt(d) folded once (scores path)

    # ---- fused key/value projection (one matmul, combined biases) ----------
    hv_flat = hv_ref[...].reshape(Bt * S, D)
    hkv = jnp.dot(hv_flat, wkv_ref[...], preferred_element_type=f32) + bkv_ref[...]
    hk = hkv[:, :d].reshape(Bt, S, d)    # key(hidden) + bk + bw
    hvv = hkv[:, d:].reshape(Bt, S, d)   # value(hidden) + bv + bw

    # ---- csk projection (wrapper pre-stacked intra|inter -> zero-copy) -----
    csk_flat = csk_ref[...].reshape(Bt * 2 * S, D)
    c_all = jnp.dot(csk_flat, ww_ref[...], preferred_element_type=f32)
    c_all = c_all.reshape(Bt, 2 * S, d)
    ci = c_all[:, :S, :]                 # (Bt, S, d)  weight(intra_csk), no bias
    ce = c_all[:, S:, :]                 # (Bt, S, d)  weight(inter_csk), no bias

    im = im_ref[...]                     # (Bt, S, 1)
    em = em_ref[...]
    mask = im + em

    # ---- scores: VPU broadcast-mul + XLU lane reduce (no M=1 MXU matmuls) --
    #   s_both = (q_s.hk)*(im+em) + (q_s.ci)*im + (q_s.ce)*em
    s_hk = jnp.sum(q_s * hk, axis=-1, keepdims=True)    # (Bt, S, 1)
    s_ci = jnp.sum(q_s * ci, axis=-1, keepdims=True)
    s_ce = jnp.sum(q_s * ce, axis=-1, keepdims=True)
    s_both = s_hk * mask + s_ci * im + s_ce * em
    s_masked = jnp.where(mask == 0.0, f32(-1000000000.0), s_both)

    # ---- softmax over S (sublane axis); EUP reciprocal + one Newton step ---
    m = jnp.max(s_masked, axis=1, keepdims=True)         # (Bt, 1, 1)
    e = jnp.exp(s_masked - m)
    denom = jnp.sum(e, axis=1, keepdims=True)
    inv = pl.reciprocal(denom, approx=True)
    inv = inv * (2.0 - denom * inv)       # Newton step -> ~full f32 precision
    probs = e * inv                                       # (Bt, S, 1)
    probs_ref[...] = probs

    # ---- enhanced features (distributive form, no k/v materialization) -----
    pi = probs * im                                       # (Bt, S, 1)
    pe = probs * em
    out_ref[...] = (pi + pe) * (q3 + hvv) + pi * ci + pe * ce


def _pick_block_b(B, S, target_rows=256):
    """Largest divisor of B with block_b*S ~<= target_rows (no forced split:
    small problems run as grid=(1,); large B splits naturally into parallel
    ~256-row steps that fill the MXU M dimension)."""
    bb = max(1, min(B, target_rows // max(S, 1)))
    while B % bb:
        bb -= 1
    return bb


def csk_measure_forward(target_vector, hidden_vectors, target_emotion,
                        intra_csk, inter_csk, intra_mask, inter_mask, params,
                        *, block_b=None):
    """Pallas implementation of CSK_Measure.forward (type='emotion')."""
    B, S, D = hidden_vectors.shape
    d = params["wq"].shape[1]
    assert d == D, "expand() in the reference requires hidden_features == x_dim"

    f32 = jnp.float32
    hv = hidden_vectors.astype(f32)

    # query precomputed over the full batch: one well-shaped (B,D)x(D,d) GEMM.
    tv = target_vector.astype(f32)                               # (B, 1, D)
    te = target_emotion.astype(f32).reshape(B, 1, 1)             # scalar per batch
    q = (tv + te) @ params["wq"].astype(f32) + params["bq"].astype(f32)   # (B, 1, d)

    # stack intra|inter csk along the sequence axis (per batch: [intra ; inter]).
    csk = jnp.concatenate([intra_csk, inter_csk], axis=1).astype(f32)     # (B, 2S, D)

    # masks transposed to (B, S, 1) so scores/probs stay in sublane layout.
    im = jnp.swapaxes(intra_mask.astype(f32), 1, 2)
    em = jnp.swapaxes(inter_mask.astype(f32), 1, 2)

    # weights pre-transposed to (in, out); key|value fused; biases pre-combined.
    wkv = jnp.concatenate([params["wk"], params["wv"]], axis=1).astype(f32)   # (D, 2d)
    bkv = jnp.concatenate([params["bk"] + params["bw"],
                           params["bv"] + params["bw"]], axis=0
                          ).astype(f32).reshape(1, 2 * d)                     # (1, 2d)
    ww = params["ww"].astype(f32)

    if block_b is None:
        block_b = _pick_block_b(B, S)
    assert B % block_b == 0
    grid = (B // block_b,)

    per_batch = lambda blk: pl.BlockSpec(blk, lambda b: (b, 0, 0))
    const = lambda blk: pl.BlockSpec(blk, lambda b: (0,) * len(blk))

    in_specs = [
        per_batch((block_b, 1, d)),        # q (precomputed query)
        per_batch((block_b, S, D)),        # hidden_vectors
        per_batch((block_b, 2 * S, D)),    # stacked csk [intra ; inter]
        per_batch((block_b, S, 1)),        # intra_mask (transposed)
        per_batch((block_b, S, 1)),        # inter_mask (transposed)
        const((D, 2 * d)), const((1, 2 * d)),   # fused key|value + combined biases
        const((D, d)),                          # csk projection weight
    ]
    out_specs = (
        per_batch((block_b, S, d)),        # final_features
        per_batch((block_b, S, 1)),        # attention_probs (transposed)
    )
    out_shape = (
        jax.ShapeDtypeStruct((B, S, d), f32),
        jax.ShapeDtypeStruct((B, S, 1), f32),
    )

    kernel = functools.partial(_csk_kernel, hidden_features=d)
    # NOTE: VMEM use per step is ~< 2 MiB at block_b*S=256, far under default
    # scoped limits; set vmem_limit_bytes only if block_b is scaled well beyond.
    final_features, probs_t = pl.pallas_call(
        kernel,
        grid=grid,
        in_specs=in_specs,
        out_specs=out_specs,
        out_shape=out_shape,
        compiler_params=pltpu.CompilerParams(dimension_semantics=("parallel",)),
    )(q, hv, csk, im, em, wkv, bkv, ww)

    return final_features, jnp.swapaxes(probs_t, 1, 2)    # probs -> (B, 1, S)


def _reference(tv, hv, te, icsk, ecsk, im, em, params, d):
    """Pure-JAX reference of the same forward pass (float32)."""
    B, S, D = hv.shape
    lin = lambda x, w, b: x @ w + b
    te_b = jnp.broadcast_to(te[:, :, None], (B, 1, D))
    q = lin(tv + te_b, params["wq"], params["bq"])
    hk = lin(hv, params["wk"], params["bk"])
    hvv = lin(hv, params["wv"], params["bv"])
    ci = lin(icsk, params["ww"], params["bw"])
    ce = lin(ecsk, params["ww"], params["bw"])
    k_i, v_i = hk + ci, hvv + ci
    k_e, v_e = hk + ce, hvv + ce
    s_i = (q @ jnp.swapaxes(k_i, -1, -2)) / math.sqrt(d) * im
    s_e = (q @ jnp.swapaxes(k_e, -1, -2)) / math.sqrt(d) * em
    mask = im + em
    p = jax.nn.softmax(jnp.where(mask == 0.0, -1e9, s_i + s_e), axis=-1)
    pi = jnp.swapaxes(p * im, 1, 2)
    pe = jnp.swapaxes(p * em, 1, 2)
    tgt = (pi + pe) * q
    csk = pi * v_i + pe * v_e
    return tgt + csk, p


if __name__ == "__main__":
    B, S, D = 8, 8, 128          # batch, seq, in_features == hidden_features
    d = D

    key = jax.random.PRNGKey(0)
    ks = jax.random.split(key, 16)

    def linear_init(kw, kb, fan_in, fan_out):
        bound = 1.0 / math.sqrt(fan_in)
        w = jax.random.uniform(kw, (fan_in, fan_out), jnp.float32, -bound, bound)
        b = jax.random.uniform(kb, (fan_out,), jnp.float32, -bound, bound)
        return w, b

    wq, bq = linear_init(ks[0], ks[1], D, d)
    wk, bk = linear_init(ks[2], ks[3], D, d)
    wv, bv = linear_init(ks[4], ks[5], D, d)
    ww, bw = linear_init(ks[6], ks[7], D, d)
    params = dict(wq=wq, bq=bq, wk=wk, bk=bk, wv=wv, bv=bv, ww=ww, bw=bw)

    target_vector = jax.random.normal(ks[8], (B, 1, D), jnp.float32)
    hidden_vectors = jax.random.normal(ks[9], (B, S, D), jnp.float32)
    target_emotion = jax.random.normal(ks[10], (B, 1), jnp.float32)
    intra_csk = jax.random.normal(ks[11], (B, S, D), jnp.float32)
    inter_csk = jax.random.normal(ks[12], (B, S, D), jnp.float32)
    # 0/1 masks that partition positions into intra / inter
    bern = jax.random.bernoulli(ks[13], 0.5, (B, 1, S))
    intra_mask = bern.astype(jnp.float32)
    inter_mask = (~bern).astype(jnp.float32)

    final_features, attention_probs = csk_measure_forward(
        target_vector, hidden_vectors, target_emotion,
        intra_csk, inter_csk, intra_mask, inter_mask, params)
    jax.block_until_ready((final_features, attention_probs))

    ref_out, ref_probs = _reference(target_vector, hidden_vectors, target_emotion,
                                    intra_csk, inter_csk, intra_mask, inter_mask,
                                    params, d)
    assert jnp.allclose(final_features, ref_out, rtol=2e-4, atol=2e-4)
    assert jnp.allclose(attention_probs, ref_probs, rtol=2e-4, atol=2e-4)

    print("KERNEL_OK")
</pallas_src>

<mosaic_0001>
module attributes {stable_mosaic.version = 11 : i64} {
  func.func @_csk_kernel(%arg0: i32, %arg1: memref<8x1x128xf32, #tpu.memory_space<vmem>>, %arg2: memref<8x8x128xf32, #tpu.memory_space<vmem>>, %arg3: memref<8x16x128xf32, #tpu.memory_space<vmem>>, %arg4: memref<8x8x1xf32, #tpu.memory_space<vmem>>, %arg5: memref<8x8x1xf32, #tpu.memory_space<vmem>>, %arg6: memref<128x256xf32, #tpu.memory_space<vmem>>, %arg7: memref<1x256xf32, #tpu.memory_space<vmem>>, %arg8: memref<128x128xf32, #tpu.memory_space<vmem>>, %arg9: memref<8x8x128xf32, #tpu.memory_space<vmem>>, %arg10: memref<8x8x1xf32, #tpu.memory_space<vmem>>) attributes {dimension_semantics = [#tpu.dimension_semantics<parallel>], iteration_bounds = array<i64: 1>, scalar_prefetch = 0 : i64, scratch_operands = 0 : i64, tpu.core_type = #tpu.core_type<tc>, window_params = [{transform_indices = @transform_0, window_bounds = array<i64: 8, 1, 128>}, {transform_indices = @transform_1, window_bounds = array<i64: 8, 8, 128>}, {transform_indices = @transform_2, window_bounds = array<i64: 8, 16, 128>}, {transform_indices = @transform_3, window_bounds = array<i64: 8, 8, 1>}, {transform_indices = @transform_4, window_bounds = array<i64: 8, 8, 1>}, {pipeline_mode = #tpu.pipeline_mode<synchronous>, transform_indices = @transform_5, window_bounds = array<i64: 128, 256>}, {pipeline_mode = #tpu.pipeline_mode<synchronous>, transform_indices = @transform_6, window_bounds = array<i64: 1, 256>}, {pipeline_mode = #tpu.pipeline_mode<synchronous>, transform_indices = @transform_7, window_bounds = array<i64: 128, 128>}, {transform_indices = @transform_8, window_bounds = array<i64: 8, 8, 128>}, {transform_indices = @transform_9, window_bounds = array<i64: 8, 8, 1>}]} {
    %c0 = arith.constant 0 : index
    %c0_0 = arith.constant 0 : index
    %c0_1 = arith.constant 0 : index
    %0 = vector.load %arg1[%c0, %c0_0, %c0_1] : memref<8x1x128xf32, #tpu.memory_space<vmem>>, vector<8x1x128xf32>
    %cst = arith.constant 0.0883883461 : f32
    %1 = vector.broadcast %cst : f32 to vector<8x1x128xf32>
    %2 = arith.mulf %0, %1 : vector<8x1x128xf32>
    %c0_2 = arith.constant 0 : index
    %c0_3 = arith.constant 0 : index
    %c0_4 = arith.constant 0 : index
    %3 = vector.load %arg2[%c0_2, %c0_3, %c0_4] : memref<8x8x128xf32, #tpu.memory_space<vmem>>, vector<8x8x128xf32>
    %4 = vector.shape_cast %3 : vector<8x8x128xf32> to vector<64x128xf32>
    %c0_5 = arith.constant 0 : index
    %c0_6 = arith.constant 0 : index
    %5 = vector.load %arg6[%c0_5, %c0_6] : memref<128x256xf32, #tpu.memory_space<vmem>>, vector<128x256xf32>
    %cst_7 = arith.constant dense<0.000000e+00> : vector<64x256xf32>
    %6 = tpu.matmul %4, %5, %cst_7 {dimension_numbers = #tpu.dot_dimension_numbers<[1], [0], [0], [1], [0, 0, 1, 1], [], []>} : vector<64x128xf32>, vector<128x256xf32>, vector<64x256xf32> -> vector<64x256xf32>
    %c0_8 = arith.constant 0 : index
    %c0_9 = arith.constant 0 : index
    %7 = vector.load %arg7[%c0_8, %c0_9] : memref<1x256xf32, #tpu.memory_space<vmem>>, vector<1x256xf32>
    %8 = vector.broadcast %7 : vector<1x256xf32> to vector<64x256xf32>
    %9 = arith.addf %6, %8 : vector<64x256xf32>
    %10 = vector.extract_strided_slice %9 {offsets = [0, 0], sizes = [64, 128], strides = [1, 1]} : vector<64x256xf32> to vector<64x128xf32>
    %11 = vector.shape_cast %10 : vector<64x128xf32> to vector<8x8x128xf32>
    %12 = vector.extract_strided_slice %9 {offsets = [0, 128], sizes = [64, 128], strides = [1, 1]} : vector<64x256xf32> to vector<64x128xf32>
    %13 = vector.shape_cast %12 : vector<64x128xf32> to vector<8x8x128xf32>
    %c0_10 = arith.constant 0 : index
    %c0_11 = arith.constant 0 : index
    %c0_12 = arith.constant 0 : index
    %14 = vector.load %arg3[%c0_10, %c0_11, %c0_12] : memref<8x16x128xf32, #tpu.memory_space<vmem>>, vector<8x16x128xf32>
    %15 = vector.shape_cast %14 : vector<8x16x128xf32> to vector<128x128xf32>
    %c0_13 = arith.constant 0 : index
    %c0_14 = arith.constant 0 : index
    %16 = vector.load %arg8[%c0_13, %c0_14] : memref<128x128xf32, #tpu.memory_space<vmem>>, vector<128x128xf32>
    %cst_15 = arith.constant dense<0.000000e+00> : vector<128x128xf32>
    %17 = tpu.matmul %15, %16, %cst_15 {dimension_numbers = #tpu.dot_dimension_numbers<[1], [0], [0], [1], [0, 0, 1, 1], [], []>} : vector<128x128xf32>, vector<128x128xf32>, vector<128x128xf32> -> vector<128x128xf32>
    %18 = vector.shape_cast %17 : vector<128x128xf32> to vector<8x16x128xf32>
    %19 = vector.extract_strided_slice %18 {offsets = [0, 0, 0], sizes = [8, 8, 128], strides = [1, 1, 1]} : vector<8x16x128xf32> to vector<8x8x128xf32>
    %20 = vector.extract_strided_slice %18 {offsets = [0, 8, 0], sizes = [8, 8, 128], strides = [1, 1, 1]} : vector<8x16x128xf32> to vector<8x8x128xf32>
    %c0_16 = arith.constant 0 : index
    %c0_17 = arith.constant 0 : index
    %c0_18 = arith.constant 0 : index
    %21 = vector.load %arg4[%c0_16, %c0_17, %c0_18] : memref<8x8x1xf32, #tpu.memory_space<vmem>>, vector<8x8x1xf32>
    %c0_19 = arith.constant 0 : index
    %c0_20 = arith.constant 0 : index
    %c0_21 = arith.constant 0 : index
    %22 = vector.load %arg5[%c0_19, %c0_20, %c0_21] : memref<8x8x1xf32, #tpu.memory_space<vmem>>, vector<8x8x1xf32>
    %23 = arith.addf %21, %22 : vector<8x8x1xf32>
    %24 = vector.broadcast %2 : vector<8x1x128xf32> to vector<8x8x128xf32>
    %25 = arith.mulf %24, %11 : vector<8x8x128xf32>
    %cst_22 = arith.constant dense<0.000000e+00> : vector<8x8xf32>
    %26 = vector.multi_reduction <add>, %25, %cst_22 [2] : vector<8x8x128xf32> to vector<8x8xf32>
    %27 = vector.shape_cast %26 : vector<8x8xf32> to vector<8x8x1xf32>
    %28 = vector.broadcast %2 : vector<8x1x128xf32> to vector<8x8x128xf32>
    %29 = arith.mulf %28, %19 : vector<8x8x128xf32>
    %cst_23 = arith.constant dense<0.000000e+00> : vector<8x8xf32>
    %30 = vector.multi_reduction <add>, %29, %cst_23 [2] : vector<8x8x128xf32> to vector<8x8xf32>
    %31 = vector.shape_cast %30 : vector<8x8xf32> to vector<8x8x1xf32>
    %32 = vector.broadcast %2 : vector<8x1x128xf32> to vector<8x8x128xf32>
    %33 = arith.mulf %32, %20 : vector<8x8x128xf32>
    %cst_24 = arith.constant dense<0.000000e+00> : vector<8x8xf32>
    %34 = vector.multi_reduction <add>, %33, %cst_24 [2] : vector<8x8x128xf32> to vector<8x8xf32>
    %35 = vector.shape_cast %34 : vector<8x8xf32> to vector<8x8x1xf32>
    %36 = arith.mulf %27, %23 : vector<8x8x1xf32>
    %37 = arith.mulf %31, %21 : vector<8x8x1xf32>
    %38 = arith.addf %36, %37 : vector<8x8x1xf32>
    %39 = arith.mulf %35, %22 : vector<8x8x1xf32>
    %40 = arith.addf %38, %39 : vector<8x8x1xf32>
    %cst_25 = arith.constant 0.000000e+00 : f32
    %41 = vector.broadcast %cst_25 : f32 to vector<8x8x1xf32>
    %42 = arith.cmpf oeq, %23, %41 : vector<8x8x1xf32>
    %cst_26 = arith.constant -1.000000e+09 : f32
    %43 = vector.broadcast %cst_26 : f32 to vector<8x8x1xf32>
    %44 = arith.select %42, %43, %40 : vector<8x8x1xi1>, vector<8x8x1xf32>
    %cst_27 = arith.constant dense<0xFF800000> : vector<8x1xf32>
    %45 = vector.multi_reduction <maximumf>, %44, %cst_27 [1] : vector<8x8x1xf32> to vector<8x1xf32>
    %46 = vector.shape_cast %45 : vector<8x1xf32> to vector<8x1x1xf32>
    %47 = vector.broadcast %46 : vector<8x1x1xf32> to vector<8x8x1xf32>
    %48 = arith.subf %44, %47 : vector<8x8x1xf32>
    %49 = math.exp %48 : vector<8x8x1xf32>
    %cst_28 = arith.constant dense<0.000000e+00> : vector<8x1xf32>
    %50 = vector.multi_reduction <add>, %49, %cst_28 [1] : vector<8x8x1xf32> to vector<8x1xf32>
    %51 = vector.shape_cast %50 : vector<8x1xf32> to vector<8x1x1xf32>
    %52 = tpu.reciprocal %51 {approx = true} : vector<8x1x1xf32> -> vector<8x1x1xf32>
    %53 = arith.mulf %51, %52 : vector<8x1x1xf32>
    %cst_29 = arith.constant 2.000000e+00 : f32
    %54 = vector.broadcast %cst_29 : f32 to vector<8x1x1xf32>
    %55 = arith.subf %54, %53 : vector<8x1x1xf32>
    %56 = arith.mulf %52, %55 : vector<8x1x1xf32>
    %57 = vector.broadcast %56 : vector<8x1x1xf32> to vector<8x8x1xf32>
    %58 = arith.mulf %49, %57 : vector<8x8x1xf32>
    %c0_30 = arith.constant 0 : index
    %c0_31 = arith.constant 0 : index
    %c0_32 = arith.constant 0 : index
    %59 = vector.load %arg10[%c0_30, %c0_31, %c0_32] : memref<8x8x1xf32, #tpu.memory_space<vmem>>, vector<8x8x1xf32>
    tpu.vector_store %arg10[%c0_30, %c0_31, %c0_32], %58 {strides = array<i32>} : memref<8x8x1xf32, #tpu.memory_space<vmem>>, vector<8x8x1xf32>,
    %60 = arith.mulf %58, %21 : vector<8x8x1xf32>
    %61 = arith.mulf %58, %22 : vector<8x8x1xf32>
    %62 = arith.addf %60, %61 : vector<8x8x1xf32>
    %63 = vector.broadcast %0 : vector<8x1x128xf32> to vector<8x8x128xf32>
    %64 = arith.addf %63, %13 : vector<8x8x128xf32>
    %65 = vector.broadcast %62 : vector<8x8x1xf32> to vector<8x8x128xf32>
    %66 = arith.mulf %65, %64 : vector<8x8x128xf32>
    %67 = vector.broadcast %60 : vector<8x8x1xf32> to vector<8x8x128xf32>
    %68 = arith.mulf %67, %19 : vector<8x8x128xf32>
    %69 = arith.addf %66, %68 : vector<8x8x128xf32>
    %70 = vector.broadcast %61 : vector<8x8x1xf32> to vector<8x8x128xf32>
    %71 = arith.mulf %70, %20 : vector<8x8x128xf32>
    %72 = arith.addf %69, %71 : vector<8x8x128xf32>
    %c0_33 = arith.constant 0 : index
    %c0_34 = arith.constant 0 : index
    %c0_35 = arith.constant 0 : index
    %73 = vector.load %arg9[%c0_33, %c0_34, %c0_35] : memref<8x8x128xf32, #tpu.memory_space<vmem>>, vector<8x8x128xf32>
    tpu.vector_store %arg9[%c0_33, %c0_34, %c0_35], %72 {strides = array<i32>} : memref<8x8x128xf32, #tpu.memory_space<vmem>>, vector<8x8x128xf32>,
    return
  }
  func.func @transform_0(%arg0: i32) -> (i32, i32, i32) {
    %c0_i32 = arith.constant 0 : i32
    %c0_i32_0 = arith.constant 0 : i32
    %c0_i32_1 = arith.constant 0 : i32
    return %arg0, %c0_i32, %c0_i32_0 : i32, i32, i32
  }
  func.func @transform_1(%arg0: i32) -> (i32, i32, i32) {
    %c0_i32 = arith.constant 0 : i32
    %c0_i32_0 = arith.constant 0 : i32
    %c0_i32_1 = arith.constant 0 : i32
    return %arg0, %c0_i32, %c0_i32_0 : i32, i32, i32
  }
  func.func @transform_2(%arg0: i32) -> (i32, i32, i32) {
    %c0_i32 = arith.constant 0 : i32
    %c0_i32_0 = arith.constant 0 : i32
    %c0_i32_1 = arith.constant 0 : i32
    return %arg0, %c0_i32, %c0_i32_0 : i32, i32, i32
  }
  func.func @transform_3(%arg0: i32) -> (i32, i32, i32) {
    %c0_i32 = arith.constant 0 : i32
    %c0_i32_0 = arith.constant 0 : i32
    %c0_i32_1 = arith.constant 0 : i32
    return %arg0, %c0_i32, %c0_i32_0 : i32, i32, i32
  }
  func.func @transform_4(%arg0: i32) -> (i32, i32, i32) {
    %c0_i32 = arith.constant 0 : i32
    %c0_i32_0 = arith.constant 0 : i32
    %c0_i32_1 = arith.constant 0 : i32
    return %arg0, %c0_i32, %c0_i32_0 : i32, i32, i32
  }
  func.func @transform_5(%arg0: i32) -> (i32, i32) {
    %c0_i32 = arith.constant 0 : i32
    %c0_i32_0 = arith.constant 0 : i32
    %c0_i32_1 = arith.constant 0 : i32
    return %c0_i32, %c0_i32_0 : i32, i32
  }
  func.func @transform_6(%arg0: i32) -> (i32, i32) {
    %c0_i32 = arith.constant 0 : i32
    %c0_i32_0 = arith.constant 0 : i32
    %c0_i32_1 = arith.constant 0 : i32
    return %c0_i32, %c0_i32_0 : i32, i32
  }
  func.func @transform_7(%arg0: i32) -> (i32, i32) {
    %c0_i32 = arith.constant 0 : i32
    %c0_i32_0 = arith.constant 0 : i32
    %c0_i32_1 = arith.constant 0 : i32
    return %c0_i32, %c0_i32_0 : i32, i32
  }
  func.func @transform_8(%arg0: i32) -> (i32, i32, i32) {
    %c0_i32 = arith.constant 0 : i32
    %c0_i32_0 = arith.constant 0 : i32
    %c0_i32_1 = arith.constant 0 : i32
    return %arg0, %c0_i32, %c0_i32_0 : i32, i32, i32
  }
  func.func @transform_9(%arg0: i32) -> (i32, i32, i32) {
    %c0_i32 = arith.constant 0 : i32
    %c0_i32_0 = arith.constant 0 : i32
    %c0_i32_1 = arith.constant 0 : i32
    return %arg0, %c0_i32, %c0_i32_0 : i32, i32, i32
  }
}

</mosaic_0001>

<bundles_post_ra>
// kernel: tpu_custom_call.1
= control target key start
LH: loop header
LB: loop body
LE: loop exit
PB: predicated region body
PF: predicated region fallthrough
CT: control target
= control target key end

     0   :  { %15 = vsyncpa [#allocation3], 0  ;;  %s1810_s0 = inlined_call_operand.vmem [shape: f32[8,1,128], index: 0, kind: input, shape index: {}]   ;;  %s1811_s1 = inlined_call_operand.hbm [shape: f32[8,8,128], index: 1, kind: input, shape index: {}]   ;;  %s1812_s2 = inlined_call_operand.vmem [shape: f32[8,16,128], index: 2, kind: input, shape index: {}]   ;;  %s1813_s3 = inlined_call_operand.vmem [shape: f32[8,8,1], index: 3, kind: input, shape index: {}]   ;;  %s1814_s4 = inlined_call_operand.vmem [shape: f32[8,8,1], index: 4, kind: input, shape index: {}]   ;;  %s1815_s5 = inlined_call_operand.hbm [shape: f32[128,256], index: 5, kind: input, shape index: {}]   ;;  %s1816_s6 = inlined_call_operand.vmem [shape: f32[1,256], index: 6, kind: input, shape index: {}]   ;;  %s1817_s7 = inlined_call_operand.hbm [shape: f32[128,128], index: 7, kind: input, shape index: {}]   ;;  %s1818_s8 = inlined_call_operand.hbm [shape: f32[8,8,128], index: 8, kind: output, shape index: {0}]   ;;  %s1819_s9 = inlined_call_operand.vmem [shape: f32[8,8,1], index: 9, kind: output, shape index: {1}]  }
   0x1   :  { %16 = vsyncpa [#allocation6], 0 }
   0x2   :  { %17 = vsyncpa [#allocation4], 0  ;;  %s1304_s30 = smov [#allocation5]  }
   0x3   :  { %s43_s10 = sshll.u32 %s1304_s30, 4  ;;  %s44_s10 = int_to_ptr.vmem [resolvable:$true] %s43_s10 }
   0x4   :  { %s1226_s11 = scalar_lea.vmem %s44_s10, 4096  ;;  %p1231_p1 = scmp.lt.s32.totalorder %s44_s10, %s44_s10 }
   0x5   :  { %p1227_p0 = scmp.ne.s32.totalorder %s44_s10, %s1226_s11  ;;  %p1232_p2 = scmp.lt.s32.totalorder %s1226_s11, %s1226_s11 }
   0x7   :  { %p1233_p3 = por %p1232_p2, %p1231_p1 }
   0x9   :  { %p1234_p4 = pnand %p1233_p3, %p1227_p0 }
   0xb   :  { %1237 = shalt.err (!%p1234_p4)
}
   0xc   :  { %s1305_s12 = smov 256   ;;  %s1306_s13 = smov 16  }
   0xd   :  { %49 = dma.hbm_to_vmem [thread:$0]  %s1815_s5, 4096, %s44_s10, [#allocation6], %s1305_s12, %s1305_s12, %s1306_s13  }
   0xe   :  { %s1307_s16 = smov [#allocation2]  }
   0xf   :  { %s25_s17 = sshll.u32 %s1307_s16, 4  ;;  %s26_s17 = int_to_ptr.vmem [resolvable:$true] %s25_s17 }
  0x10   :  { %s1246_s18 = scalar_lea.vmem %s26_s17, 1024  ;;  %p1251_p6 = scmp.lt.s32.totalorder %s26_s17, %s26_s17 }
  0x11   :  { %p1247_p5 = scmp.ne.s32.totalorder %s26_s17, %s1246_s18  ;;  %p1252_p7 = scmp.lt.s32.totalorder %s1246_s18, %s1246_s18 }
  0x13   :  { %p1253_p8 = por %p1252_p7, %p1251_p6 }
  0x15   :  { %p1254_p9 = pnand %p1253_p8, %p1247_p5 }
  0x17   :  { %1257 = shalt.err (!%p1254_p9)
}
  0x18   :  { %s1308_s19 = smov 128   ;;  %s1309_s20 = smov 8  }
  0x19   :  { %31 = dma.hbm_to_vmem [thread:$0]  %s1811_s1, 1024, %s26_s17, [#allocation3], %s1308_s19, %s1308_s19, %s1309_s20  }
  0x1a   :  { %s1310_s5 = smov [#allocation7]  }
  0x1b   :  { %s57_s23 = sshll.u32 %s1310_s5, 4  ;;  %s58_s23 = int_to_ptr.vmem [resolvable:$true] %s57_s23 }
  0x1c   :  { %s1266_s24 = scalar_lea.vmem %s58_s23, 2048  ;;  %p1271_p11 = scmp.lt.s32.totalorder %s58_s23, %s58_s23 }
  0x1d   :  { %p1267_p10 = scmp.ne.s32.totalorder %s58_s23, %s1266_s24  ;;  %p1272_p12 = scmp.lt.s32.totalorder %s1266_s24, %s1266_s24 }
  0x1f   :  { %p1273_p13 = por %p1272_p12, %p1271_p11 }
  0x21   :  { %p1274_p0 = pnand %p1273_p13, %p1267_p10 }
  0x23   :  { %1277 = shalt.err (!%p1274_p0)
}
  0x24   :  { %63 = dma.hbm_to_vmem [thread:$0]  %s1817_s7, 2048, %s58_s23, [#allocation6], %s1308_s19, %s1308_s19, %s1309_s20  }
  0x25   :  { %1298 = dma.done.wait [#allocation3], 1024  }
  0x26   :  { %1299 = vsyncadd [#allocation3], 4294966272 }
  0x27   :  { %1300 = dma.done.wait [#allocation6], 6144  }
  0x28   :  { %1301 = vsyncadd [#allocation6], 4294961152  ;;  %v1311_v0 = vmov 0.0   ;;  %v128_v1 = vld [vmem:[#allocation5 + $0xf8] sm:$0xff]  ;;  %v127_v3 = vld [vmem:[#allocation5 + $0xf0] sm:$0xff]  ;;  %vm631_vm1 = vcmask 7168  }
  0x29   :  { %205 = vmatprep.mubr.f32.mxu0 %v1311_v0  ;;  %v285_v2 = vld [vmem:[#allocation7 + $0x78] sm:$0xff]  ;;  %141 = vmatprep.subr.mxu0 %v128_v1  ;;  %v126_v4 = vld [vmem:[#allocation5 + $0xe8] sm:$0xff]  ;;  %v284_v5 = vld [vmem:[#allocation7 + $0x70] sm:$0xff] }
  0x2a   :  { %1118 = vmatprep.subr.mxu1 %v285_v2  ;;  %v125_v6 = vld [vmem:[#allocation5 + $0xe0] sm:$0xff]  ;;  %142 = vmatpush1.msra.mxu0 %v127_v3  ;;  %v124_v7 = vld [vmem:[#allocation5 + $0xd8] sm:$0xff]  ;;  %v283_v8 = vld [vmem:[#allocation7 + $0x68] sm:$0xff] }
  0x2b   :  { %1119 = vmatpush3.msra.mxu1 %v285_v2  ;;  %143 = vmatprep.subr.mxu0 %v126_v4  ;;  %v123_v9 = vld [vmem:[#allocation5 + $0xd0] sm:$0xff]  ;;  %v122_v10 = vld [vmem:[#allocation5 + $0xc8] sm:$0xff]  ;;  %v282_v11 = vld [vmem:[#allocation7 + $0x60] sm:$0xff] }
  0x2c   :  { %1120 = vmatprep.subr.mxu1 %v284_v5  ;;  %144 = vmatpush1.msra.mxu0 %v125_v6  ;;  %v121_v12 = vld [vmem:[#allocation5 + $0xc0] sm:$0xff]  ;;  %v120_v13 = vld [vmem:[#allocation5 + $0xb8] sm:$0xff]  ;;  %v119_v15 = vld [vmem:[#allocation5 + $0xb0] sm:$0xff] }
  0x2d   :  { %1121 = vmatpush3.msra.mxu1 %v284_v5  ;;  %145 = vmatprep.subr.mxu0 %v124_v7  ;;  %v281_v14 = vld [vmem:[#allocation7 + $0x58] sm:$0xff]  ;;  %v118_v16 = vld [vmem:[#allocation5 + $0xa8] sm:$0xff]  ;;  %v280_v17 = vld [vmem:[#allocation7 + $0x50] sm:$0xff] }
  0x2e   :  { %1122 = vmatprep.subr.mxu1 %v283_v8  ;;  %146 = vmatpush1.msra.mxu0 %v123_v9  ;;  %v117_v18 = vld [vmem:[#allocation5 + $0xa0] sm:$0xff]  ;;  %v116_v19 = vld [vmem:[#allocation5 + $0x98] sm:$0xff]  ;;  %v279_v20 = vld [vmem:[#allocation7 + $0x48] sm:$0xff] }
  0x2f   :  { %1123 = vmatpush3.msra.mxu1 %v283_v8  ;;  %147 = vmatprep.subr.mxu0 %v122_v10  ;;  %v115_v21 = vld [vmem:[#allocation5 + $0x90] sm:$0xff]  ;;  %v114_v22 = vld [vmem:[#allocation5 + $0x88] sm:$0xff]  ;;  %v278_v23 = vld [vmem:[#allocation7 + $0x40] sm:$0xff]  ;;  %v131_v10 = vlaneseq }
  0x30   :  { %1124 = vmatprep.subr.mxu1 %v282_v11  ;;  %148 = vmatpush1.msra.mxu0 %v121_v12  ;;  %v113_v24 = vld [vmem:[#allocation5 + $0x80] sm:$0xff]  ;;  %v112_v25 = vld [vmem:[#allocation5 + $0x78] sm:$0xff]  ;;  %v111_v27 = vld [vmem:[#allocation5 + $0x70] sm:$0xff] }
  0x31   :  { %1125 = vmatpush3.msra.mxu1 %v282_v11  ;;  %149 = vmatprep.subr.mxu0 %v120_v13  ;;  %v277_v26 = vld [vmem:[#allocation7 + $0x38] sm:$0xff]  ;;  %v110_v28 = vld [vmem:[#allocation5 + $0x68] sm:$0xff]  ;;  %v276_v29 = vld [vmem:[#allocation7 + $0x30] sm:$0xff]  ;;  %v132_v11 = vshrl.u32 %v131_v10, 7 }
  0x32   :  { %1126 = vmatprep.subr.mxu1 %v281_v14  ;;  %150 = vmatpush1.msra.mxu0 %v119_v15  ;;  %v109_v30 = vld [vmem:[#allocation5 + $0x60] sm:$0xff]  ;;  %v108_v31 = vld [vmem:[#allocation5 + $0x58] sm:$0xff]  ;;  %v275_v32 = vld [vmem:[#allocation7 + $0x28] sm:$0xff] }
  0x33   :  { %1127 = vmatpush3.msra.mxu1 %v281_v14  ;;  %151 = vmatprep.subr.mxu0 %v118_v16  ;;  %v107_v33 = vld [vmem:[#allocation5 + $0x50] sm:$0xff]  ;;  %v106_v34 = vld [vmem:[#allocation5 + $0x48] sm:$0xff]  ;;  %v274_v35 = vld [vmem:[#allocation7 + $0x20] sm:$0xff]  ;;  %v137_v15 = vsub.s32 1, %v132_v11 }
  0x34   :  { %1128 = vmatprep.subr.mxu1 %v280_v17  ;;  %152 = vmatpush1.msra.mxu0 %v117_v18  ;;  %v105_v36 = vld [vmem:[#allocation5 + $0x40] sm:$0xff]  ;;  %v104_v37 = vld [vmem:[#allocation5 + $0x38] sm:$0xff]  ;;  %v103_v39 = vld [vmem:[#allocation5 + $0x30] sm:$0xff] }
  0x35   :  { %1129 = vmatpush3.msra.mxu1 %v280_v17  ;;  %153 = vmatprep.subr.mxu0 %v116_v19  ;;  %v273_v38 = vld [vmem:[#allocation7 + $0x18] sm:$0xff]  ;;  %v102_v40 = vld [vmem:[#allocation5 + $0x28] sm:$0xff]  ;;  %v272_v41 = vld [vmem:[#allocation7 + $0x10] sm:$0xff] }
  0x36   :  { %1130 = vmatprep.subr.mxu1 %v279_v20  ;;  %154 = vmatpush1.msra.mxu0 %v115_v21  ;;  %v101_v42 = vld [vmem:[#allocation5 + $0x20] sm:$0xff]  ;;  %v100_v43 = vld [vmem:[#allocation5 + $0x18] sm:$0xff]  ;;  %v271_v44 = vld [vmem:[#allocation7 + $0x8] sm:$0xff] }
  0x37   :  { %1131 = vmatpush3.msra.mxu1 %v279_v20  ;;  %155 = vmatprep.subr.mxu0 %v114_v22  ;;  %v99_v45 = vld [vmem:[#allocation5 + $0x10] sm:$0xff]  ;;  %v98_v46 = vld [vmem:[#allocation5 + $0x8] sm:$0xff]  ;;  %v270_v47 = vld [vmem:[#allocation7] sm:$0xff] }
  0x38   :  { %1132 = vmatprep.subr.mxu1 %v278_v23  ;;  %156 = vmatpush1.msra.mxu0 %v113_v24  ;;  %v97_v48 = vld [vmem:[#allocation5] sm:$0xff]  ;;  %v255_v51 = vld [vmem:[%s1812_s2 + $0x8] sm:$0xff]  ;;  %v256_v52 = vld [vmem:[%s1812_s2 + $0x10] sm:$0xff] }
  0x39   :  { %1133 = vmatpush3.msra.mxu1 %v278_v23  ;;  %157 = vmatprep.subr.mxu0 %v112_v25  ;;  %v254_v49 = vld [vmem:[%s1812_s2] sm:$0xff]  ;;  %v90_v53 = vld [vmem:[#allocation2 + $0x8] sm:$0xff]  ;;  %v257_v54 = vld [vmem:[%s1812_s2 + $0x18] sm:$0xff] }
  0x3a   :  { %1134 = vmatprep.subr.mxu1 %v277_v26  ;;  %158 = vmatpush1.msra.mxu0 %v111_v27  ;;  %v89_v50 = vld [vmem:[#allocation2] sm:$0xff]  ;;  %v91_v56 = vld [vmem:[#allocation2 + $0x10] sm:$0xff]  ;;  %v259_v57 = vld [vmem:[%s1812_s2 + $0x28] sm:$0xff] }
  0x3b   :  { %1135 = vmatpush3.msra.mxu1 %v277_v26  ;;  %159 = vmatprep.subr.mxu0 %v110_v28  ;;  %v258_v55 = vld [vmem:[%s1812_s2 + $0x20] sm:$0xff]  ;;  %v260_v58 = vld [vmem:[%s1812_s2 + $0x30] sm:$0xff]  ;;  %v92_v59 = vld [vmem:[#allocation2 + $0x18] sm:$0xff] }
  0x3c   :  { %1136 = vmatprep.subr.mxu1 %v276_v29  ;;  %160 = vmatpush1.msra.mxu0 %v109_v30  ;;  %v261_v60 = vld [vmem:[%s1812_s2 + $0x38] sm:$0xff]  ;;  %v262_v61 = vld [vmem:[%s1812_s2 + $0x40] sm:$0xff]  ;;  %v263_v63 = vld [vmem:[%s1812_s2 + $0x48] sm:$0xff] }
  0x3d   :  { %1137 = vmatpush3.msra.mxu1 %v276_v29  ;;  %161 = vmatprep.subr.mxu0 %v108_v31  ;;  %v93_v62 = vld [vmem:[#allocation2 + $0x20] sm:$0xff]  ;;  %v264_v1 = vld [vmem:[%s1812_s2 + $0x50] sm:$0xff]  ;;  %v94_v2 = vld [vmem:[#allocation2 + $0x28] sm:$0xff] }
  0x3e   :  { %1138 = vmatprep.subr.mxu1 %v275_v32  ;;  %162 = vmatpush1.msra.mxu0 %v107_v33  ;;  %v265_v3 = vld [vmem:[%s1812_s2 + $0x58] sm:$0xff]  ;;  %v266_v4 = vld [vmem:[%s1812_s2 + $0x60] sm:$0xff]  ;;  %v95_v5 = vld [vmem:[#allocation2 + $0x30] sm:$0xff] }
  0x3f   :  { %1139 = vmatpush3.msra.mxu1 %v275_v32  ;;  %163 = vmatprep.subr.mxu0 %v106_v34  ;;  %v267_v6 = vld [vmem:[%s1812_s2 + $0x68] sm:$0xff]  ;;  %v268_v7 = vld [vmem:[%s1812_s2 + $0x70] sm:$0xff]  ;;  %v96_v8 = vld [vmem:[#allocation2 + $0x38] sm:$0xff] }
  0x40   :  { %1140 = vmatprep.subr.mxu1 %v274_v35  ;;  %164 = vmatpush1.msra.mxu0 %v105_v36  ;;  %v269_v9 = vld [vmem:[%s1812_s2 + $0x78] sm:$0xff]  ;;  %v73_v12 = vld [vmem:[%s1810_s0] sm:$0x1]  ;;  %v74_v16 = vld [vmem:[%s1810_s0 + $0x1] sm:$0x1] }
  0x41   :  { %1141 = vmatpush3.msra.mxu1 %v274_v35  ;;  %165 = vmatprep.subr.mxu0 %v104_v37  ;;  %v129_v13 = vld [vmem:[%s1816_s6] sm:$0x3]  ;;  %v81_v14 = vmul.f32 0.088388346, %v73_v12  ;;  %v82_v19 = vmul.f32 0.088388346, %v74_v16 }
  0x42   :  { %1142 = vmatprep.subr.mxu1 %v273_v38  ;;  %166 = vmatpush1.msra.mxu0 %v103_v39  ;;  %v1450_v20 = vrot.slane %v129_v13, %v137_v15  ;;  %v75_v24 = vld [vmem:[%s1810_s0 + $0x2] sm:$0x1]  ;;  %v76_v35 = vld [vmem:[%s1810_s0 + $0x3] sm:$0x1] }
  0x43   :  { %1143 = vmatpush3.msra.mxu1 %v273_v38  ;;  %167 = vmatprep.subr.mxu0 %v102_v40  ;;  %v83_v33 = vmul.f32 0.088388346, %v75_v24 }
  0x44   :  { %1144 = vmatprep.subr.mxu1 %v272_v41  ;;  %168 = vmatpush1.msra.mxu0 %v101_v42  ;;  %1829 = vst [vmem:[#allocation13_spill] sm:$0xff] %v1450_v20 }
  0x45   :  { %1145 = vmatpush3.msra.mxu1 %v272_v41  ;;  %169 = vmatprep.subr.mxu0 %v100_v43 }
  0x46   :  { %1146 = vmatprep.subr.mxu1 %v271_v44  ;;  %170 = vmatpush1.msra.mxu0 %v99_v45 }
  0x47   :  { %1147 = vmatpush3.msra.mxu1 %v271_v44  ;;  %171 = vmatprep.subr.mxu0 %v98_v46  ;;  %v84_v46 = vmul.f32 0.088388346, %v76_v35 }
  0x48   :  { %1148 = vmatprep.subr.mxu1 %v270_v47  ;;  %172 = vmatpush1.msra.mxu0 %v97_v48 }
  0x49   :  { %1149 = vmatpush3.msra.mxu1 %v270_v47  ;;  %1150 = vmatprep.mubr.f32.mxu1 %v254_v49 }
  0x4a   :  { %206 = vmatmul.mubr.f32.vlgmr.msra.gmra.mxu0 %v89_v50  ;;  %1151 = vmatmul.mubr.f32.vlgmr.msra.gmra.mxu1 %v255_v51 }
  0x4b   :  { %211 = vmatprep.mubr.f32.mxu0 %v1311_v0  ;;  %1153 = vmatprep.mubr.f32.mxu1 %v256_v52 }
  0x4e   :  { %212 = vmatmul.mubr.f32.gmra.mxu0 %v90_v53  ;;  %1154 = vmatmul.mubr.f32.gmra.mxu1 %v257_v54 }
  0x4f   :  { %217 = vmatprep.mubr.f32.mxu0 %v1311_v0  ;;  %1156 = vmatprep.mubr.f32.mxu1 %v258_v55 }
  0x52   :  { %218 = vmatmul.mubr.f32.gmra.mxu0 %v91_v56  ;;  %1157 = vmatmul.mubr.f32.gmra.mxu1 %v259_v57 }
  0x53   :  { %223 = vmatprep.mubr.f32.mxu0 %v1311_v0  ;;  %1159 = vmatprep.mubr.f32.mxu1 %v260_v58 }
  0x56   :  { %224 = vmatmul.mubr.f32.gmra.mxu0 %v92_v59  ;;  %1160 = vmatmul.mubr.f32.gmra.mxu1 %v261_v60  ;;  %v77_v60 = vld [vmem:[%s1810_s0 + $0x4] sm:$0x1] }
  0x57   :  { %229 = vmatprep.mubr.f32.mxu0 %v1311_v0  ;;  %1162 = vmatprep.mubr.f32.mxu1 %v262_v61 }
  0x5a   :  { %230 = vmatmul.mubr.f32.gmra.mxu0 %v93_v62  ;;  %1163 = vmatmul.mubr.f32.gmra.mxu1 %v263_v63 }
  0x5b   :  { %235 = vmatprep.mubr.f32.mxu0 %v1311_v0  ;;  %1165 = vmatprep.mubr.f32.mxu1 %v264_v1 }
  0x5e   :  { %236 = vmatmul.mubr.f32.gmra.mxu0 %v94_v2  ;;  %1166 = vmatmul.mubr.f32.gmra.mxu1 %v265_v3 }
  0x5f   :  { %241 = vmatprep.mubr.f32.mxu0 %v1311_v0  ;;  %1168 = vmatprep.mubr.f32.mxu1 %v266_v4 }
  0x62   :  { %242 = vmatmul.mubr.f32.gmra.mxu0 %v95_v5  ;;  %1169 = vmatmul.mubr.f32.gmra.mxu1 %v267_v6 }
  0x63   :  { %247 = vmatprep.mubr.f32.mxu0 %v1311_v0  ;;  %1171 = vmatprep.mubr.f32.mxu1 %v268_v7  ;;  %v1441_v0 = vsub.s32 0, %v132_v11  ;;  %v85_v7 = vmul.f32 0.088388346, %v77_v60 }
  0x65   :  { %1828 = vst [vmem:[#allocation12_spill] sm:$0xff] %v1441_v0  ;;  %v1447_v17 = vrot.slane %v129_v13, %v1441_v0  ;;  %v466_v18 = vrot.slane %v81_v14, %v1441_v0  ;;  %v851_v25 = vrot.slane %v73_v12, %v1441_v0  ;;  %v470_v28 = vrot.slane %v82_v19, %v1441_v0 }
  0x66   :  { %248 = vmatmul.mubr.f32.gmra.mxu0 %v96_v8  ;;  %1172 = vmatmul.mubr.f32.gmra.mxu1 %v269_v9  ;;  %v855_v37 = vrot.slane %v74_v16, %v1441_v0  ;;  %v474_v45 = vrot.slane %v83_v33, %v1441_v0  ;;  %v859_v50 = vrot.slane %v75_v24, %v1441_v0  ;;  %v78_v9 = vld [vmem:[%s1810_s0 + $0x5] sm:$0x1]  ;;  %v79_v33 = vld [vmem:[%s1810_s0 + $0x6] sm:$0x1] }
  0x67   :  { %v478_v58 = vrot.slane %v84_v46, %v1441_v0  ;;  %v863_v62 = vrot.slane %v76_v35, %v1441_v0  ;;  %v867_v11 = vrot.slane %v77_v60, %v1441_v0  ;;  %v482_v16 = vrot.slane %v85_v7, %v1441_v0 }
  0x68   :  { %v86_v19 = vmul.f32 0.088388346, %v78_v9  ;;  %v87_v46 = vmul.f32 0.088388346, %v79_v33 }
 0x10a   :  { %v207_v21 = vpop.f32.mrf.mxu0  ;;  %v1453_v23 = vpop.f32.mrf.mxu1 }
 0x10b   :  { %v208_v22 = vadd.f32 %v207_v21, %v1447_v17  ;;  %v551_v27 = vmul.f32 %v1453_v23, %v466_v18 }
 0x10c   :  { %v209_v26 = vpop.f32.mrf.mxu0  ;;  %v1462_v30 = vpop.f32.mrf.mxu1 }
 0x10d   :  { %v210_v29 = vadd.f32 %v209_v26, %v1450_v20  ;;  %559 = vadd.xlane.f32.xlu0 %v551_v27  ;;  %v503_v32 = vmul.f32 %v466_v18, %v208_v22  ;;  %v527_v51 = vmul.f32 %v466_v18, %v1462_v30  ;;  %v871_v22 = vrot.slane %v78_v9, %v1441_v0 }
 0x10e   :  { %v213_v31 = vpop.f32.mrf.mxu0  ;;  %v1464_v34 = vpop.f32.mrf.mxu1 }
 0x10f   :  { %v1469_v36 = vadd.f32 %v851_v25, %v210_v29  ;;  %v552_v38 = vmul.f32 %v1464_v34, %v470_v28  ;;  %v214_v42 = vadd.f32 %v213_v31, %v1447_v17  ;;  %v486_v31 = vrot.slane %v86_v19, %v1441_v0 }
 0x110   :  { %v215_v39 = vpop.f32.mrf.mxu0  ;;  %v1474_v41 = vpop.f32.mrf.mxu1 }
 0x111   :  { %v216_v40 = vadd.f32 %v215_v39, %v1450_v20  ;;  %561 = vadd.xlane.f32.xlu1 %v552_v38  ;;  %511 = vadd.xlane.f32.xlu0 %v503_v32  ;;  %v528_v44 = vmul.f32 %v470_v28, %v1474_v41  ;;  %v504_v56 = vmul.f32 %v470_v28, %v214_v42 }
 0x112   :  { %v219_v43 = vpop.f32.mrf.mxu0  ;;  %v1480_v48 = vpop.f32.mrf.mxu1  ;;  %v875_v38 = vrot.slane %v79_v33, %v1441_v0 }
 0x113   :  { %v220_v47 = vadd.f32 %v219_v43, %v1447_v17  ;;  %v1482_v49 = vadd.f32 %v855_v37, %v216_v40  ;;  %v553_v5 = vmul.f32 %v1480_v48, %v474_v45 }
 0x114   :  { %v221_v52 = vpop.f32.mrf.mxu0  ;;  %v1486_v53 = vpop.f32.mrf.mxu1 }
 0x115   :  { %v222_v54 = vadd.f32 %v221_v52, %v1450_v20  ;;  %537 = vadd.xlane.f32.xlu1 %v528_v44  ;;  %535 = vadd.xlane.f32.xlu0 %v527_v51  ;;  %v505_v55 = vmul.f32 %v474_v45, %v220_v47  ;;  %v529_v24 = vmul.f32 %v474_v45, %v1486_v53  ;;  %v1541_v47 = vld [vmem:[%s1810_s0 + $0x7] sm:$0x1] }
 0x116   :  { %v225_v57 = vpop.f32.mrf.mxu0  ;;  %v1490_v59 = vpop.f32.mrf.mxu1  ;;  %1832 = vst [vmem:[#allocation16_spill] sm:$0xff] %v1541_v47  ;;  %v88_v52 = vmul.f32 0.088388346, %v1541_v47 }
 0x117   :  { %v1495_v61 = vadd.f32 %v859_v50, %v222_v54  ;;  %v226_v3 = vadd.f32 %v225_v57, %v1447_v17  ;;  %v554_v4 = vmul.f32 %v1490_v59, %v478_v58 }
 0x118   :  { %v227_v63 = vpop.f32.mrf.mxu0  ;;  %v1498_v1 = vpop.f32.mrf.mxu1 }
 0x119   :  { %v228_v2 = vadd.f32 %v227_v63, %v1450_v20  ;;  %515 = vadd.xlane.f32.xlu1 %v505_v55  ;;  %513 = vadd.xlane.f32.xlu0 %v504_v56  ;;  %v506_v15 = vmul.f32 %v478_v58, %v226_v3  ;;  %v530_v39 = vmul.f32 %v478_v58, %v1498_v1 }
 0x11a   :  { %v231_v6 = vpop.f32.mrf.mxu0  ;;  %v1504_v8 = vpop.f32.mrf.mxu1  ;;  %v490_v56 = vrot.slane %v87_v46, %v1441_v0  ;;  %v1599_v46 = vld [vmem:[%s1814_s4 + $0x10] sm:$0xff] }
 0x11b   :  { %v1509_v10 = vadd.f32 %v863_v62, %v228_v2  ;;  %v232_v28 = vadd.f32 %v231_v6, %v1447_v17  ;;  %v555_v29 = vmul.f32 %v1504_v8, %v482_v16  ;;  %v494_v62 = vrot.slane %v88_v52, %v1441_v0 }
 0x11c   :  { %v233_v12 = vpop.f32.mrf.mxu0  ;;  %v1512_v13 = vpop.f32.mrf.mxu1 }
 0x11d   :  { %v234_v14 = vadd.f32 %v233_v12, %v1450_v20  ;;  %565 = vadd.xlane.f32.xlu1 %v554_v4  ;;  %563 = vadd.xlane.f32.xlu0 %v553_v5  ;;  %v507_v45 = vmul.f32 %v482_v16, %v232_v28  ;;  %v531_v60 = vmul.f32 %v482_v16, %v1512_v13  ;;  %v1312_v12 = vmov 0   ;;  %v1572_v16 = vld [vmem:[%s1814_s4] sm:$0xff] }
 0x11e   :  { %v237_v18 = vpop.f32.mrf.mxu0  ;;  %v1520_v26 = vpop.f32.mrf.mxu1  ;;  %1184 = vset.pattern.permute.xlu1 %v1312_v12  ;;  %1185 = vset.pattern.permute.xlu0 %v1312_v12 }
 0x11f   :  { %v1516_v21 = vadd.f32 %v867_v11, %v234_v14  ;;  %1830 = vst [vmem:[#allocation14_spill] sm:$0xff] %v1520_v26  ;;  %v238_v43 = vadd.f32 %v237_v18, %v1447_v17  ;;  %v556_v44 = vmul.f32 %v1520_v26, %v486_v31 }
 0x120   :  { %v239_v25 = vpop.f32.mrf.mxu0  ;;  %v1529_v35 = vpop.f32.mrf.mxu1 }
 0x121   :  { %v240_v27 = vadd.f32 %v239_v25, %v1450_v20  ;;  %517 = vadd.xlane.f32.xlu1 %v506_v15  ;;  %539 = vadd.xlane.f32.xlu0 %v529_v24  ;;  %v508_v55 = vmul.f32 %v486_v31, %v238_v43  ;;  %v532_v2 = vmul.f32 %v486_v31, %v1529_v35  ;;  %v1567_v15 = vld [vmem:[%s1813_s3] sm:$0xff]  ;;  %v1579_v24 = vld [vmem:[%s1814_s4 + $0x8] sm:$0xff] }
 0x122   :  { %v243_v32 = vpop.f32.mrf.mxu0  ;;  %v1543_v50 = vpop.f32.mrf.mxu1  ;;  %v1584_v25 = vld [vmem:[%s1813_s3 + $0x8] sm:$0xff] }
 0x123   :  { %v1531_v37 = vadd.f32 %v871_v22, %v240_v27  ;;  %1833 = vst [vmem:[#allocation17_spill] sm:$0xff] %v1543_v50  ;;  %v244_v54 = vadd.f32 %v243_v32, %v1447_v17  ;;  %v557_v11 = vmul.f32 %v1543_v50, %v490_v56  ;;  %v447_v22 = vadd.f32 %v1572_v16, %v1567_v15 }
 0x124   :  { %v245_v40 = vpop.f32.mrf.mxu0  ;;  %v1550_v58 = vpop.f32.mrf.mxu1  ;;  %v448_v32 = vadd.f32 %v1579_v24, %v1584_v25 }
 0x125   :  { %1831 = vst [vmem:[#allocation15_spill] sm:$0xff] %v1531_v37  ;;  %v246_v42 = vadd.f32 %v245_v40, %v1450_v20  ;;  %541 = vadd.xlane.f32.xlu1 %v530_v39  ;;  %567 = vadd.xlane.f32.xlu0 %v555_v29  ;;  %1835 = vst [vmem:[#allocation19_spill] sm:$0xff] %v1550_v58  ;;  %v509_v3 = vmul.f32 %v490_v56, %v244_v54  ;;  %vm615_vm0 = vcmp.eq.f32.partialorder %v447_v22, 0.0 }
 0x126   :  { %v249_v57 = vpop.f32.mrf.mxu0  ;;  %v1556_v4 = vpop.f32.mrf.mxu1  ;;  %v533_v6 = vmul.f32 %v490_v56, %v1550_v58  ;;  %vm616_vm2 = vcmp.eq.f32.partialorder %v448_v32, 0.0 }
 0x127   :  { %v1545_v51 = vadd.f32 %v875_v38, %v246_v42  ;;  %v250_v63 = vadd.f32 %v249_v57, %v1447_v17  ;;  %1836 = vst [vmem:[#allocation20_spill] sm:$0xff] %v1556_v4  ;;  %v558_v17 = vmul.f32 %v1556_v4, %v494_v62  ;;  %v1606_v57 = vld [vmem:[%s1814_s4 + $0x18] sm:$0xff] }
 0x128   :  { %v1559_v7 = vpop.f32.mrf.mxu1 }
 0x129   :  { %1834 = vst [vmem:[#allocation18_spill] sm:$0xff] %v1545_v51  ;;  %569 = vadd.xlane.f32.xlu1 %v556_v44  ;;  %519 = vadd.xlane.f32.xlu0 %v507_v45  ;;  %v510_v5 = vmul.f32 %v494_v62, %v250_v63  ;;  %1837 = vst [vmem:[#allocation21_spill] sm:$0xff] %v1559_v7  ;;  %v534_v9 = vmul.f32 %v494_v62, %v1559_v7  ;;  %v1594_v45 = vld [vmem:[%s1813_s3 + $0x10] sm:$0xff]  ;;  %v1611_v63 = vld [vmem:[%s1813_s3 + $0x18] sm:$0xff] }
 0x12d   :  { %521 = vadd.xlane.f32.xlu1 %v508_v55  ;;  %543 = vadd.xlane.f32.xlu0 %v531_v60 }
 0x131   :  { %545 = vadd.xlane.f32.xlu1 %v532_v2  ;;  %523 = vadd.xlane.f32.xlu0 %v509_v3  ;;  %v449_v3 = vadd.f32 %v1599_v46, %v1594_v45 }
 0x133   :  { %vm617_vm3 = vcmp.eq.f32.partialorder %v449_v3, 0.0 }
 0x135   :  { %525 = vadd.xlane.f32.xlu1 %v510_v5  ;;  %547 = vadd.xlane.f32.xlu0 %v533_v6 }
 0x139   :  { %549 = vadd.xlane.f32.xlu1 %v534_v9  ;;  %571 = vadd.xlane.f32.xlu0 %v557_v11  ;;  %v450_v11 = vadd.f32 %v1606_v57, %v1611_v63 }
 0x13b   :  { %vm618_vm4 = vcmp.eq.f32.partialorder %v450_v11, 0.0 }
 0x13d   :  { %573 = vadd.xlane.f32.xlu1 %v558_v17 }
 0x196   :  { %v560_v14 = vpop.xlane.xlu0 %559 }
 0x197   :  { %v599_v33 = vmul.f32 %v560_v14, %v1572_v16 }
 0x19a   :  { %v562_v18 = vpop.xlane.xlu1 %561  ;;  %v512_v19 = vpop.xlane.xlu0 %511 }
 0x19b   :  { %v575_v29 = vmul.f32 %v512_v19, %v447_v22  ;;  %v600_v52 = vmul.f32 %v562_v18, %v1579_v24 }
 0x19e   :  { %v538_v27 = vpop.xlane.xlu1 %537  ;;  %v536_v28 = vpop.xlane.xlu0 %535 }
 0x19f   :  { %v583_v31 = vmul.f32 %v536_v28, %v1567_v15  ;;  %v584_v42 = vmul.f32 %v538_v27, %v1584_v25 }
 0x1a1   :  { %v591_v38 = vadd.f32 %v583_v31, %v575_v29 }
 0x1a2   :  { %v516_v39 = vpop.xlane.xlu1 %515  ;;  %v514_v40 = vpop.xlane.xlu0 %513 }
 0x1a3   :  { %v607_v43 = vadd.f32 %v599_v33, %v591_v38  ;;  %v576_v44 = vmul.f32 %v514_v40, %v448_v32  ;;  %v577_v19 = vmul.f32 %v516_v39, %v449_v3  ;;  %v1624_v39 = vld [vmem:[%s1813_s3 + $0x20] sm:$0xff] }
 0x1a4   :  { %v1632_v3 = vld [vmem:[%s1814_s4 + $0x20] sm:$0xff] }
 0x1a5   :  { %v623_v54 = vsel %vm615_vm0, -1e+09, %v607_v43  ;;  %v592_v55 = vadd.f32 %v584_v42, %v576_v44 }
 0x1a6   :  { %v632_v56 = vsel %vm631_vm1, %v623_v54, -inf  ;;  %v566_v60 = vpop.xlane.xlu1 %565  ;;  %v564_v62 = vpop.xlane.xlu0 %563 }
 0x1a7   :  { %v633_v2 = vrot.slane %v632_v56, 4  ;;  %v608_v5 = vadd.f32 %v600_v52, %v592_v55  ;;  %v601_v28 = vmul.f32 %v564_v62, %v1599_v46  ;;  %v602_v55 = vmul.f32 %v566_v60, %v1606_v57 }
 0x1a9   :  { %v634_v6 = vmax.f32 %v632_v56, %v633_v2  ;;  %v624_v9 = vsel %vm616_vm2, -1e+09, %v608_v5 }
 0x1aa   :  { %v639_v17 = vsel %vm631_vm1, %v624_v9, -inf  ;;  %v518_v12 = vpop.xlane.xlu1 %517  ;;  %v540_v14 = vpop.xlane.xlu0 %539 }
 0x1ab   :  { %v635_v18 = vrot.slane %v634_v6, 2  ;;  %v640_v22 = vrot.slane %v639_v17, 4  ;;  %v585_v27 = vmul.f32 %v540_v14, %v1594_v45  ;;  %v578_v32 = vmul.f32 %v518_v12, %v450_v11 }
 0x1ac   :  { %v451_v14 = vadd.f32 %v1632_v3, %v1624_v39 }
 0x1ad   :  { %v636_v29 = vmax.f32 %v634_v6, %v635_v18  ;;  %v641_v31 = vmax.f32 %v639_v17, %v640_v22  ;;  %v593_v33 = vadd.f32 %v585_v27, %v577_v19  ;;  %v1637_v6 = vld [vmem:[%s1814_s4 + $0x28] sm:$0xff] }
 0x1ae   :  { %v542_v38 = vpop.xlane.xlu1 %541  ;;  %v568_v40 = vpop.xlane.xlu0 %567  ;;  %v1642_v17 = vld [vmem:[%s1813_s3 + $0x28] sm:$0xff]  ;;  %vm619_vm5 = vcmp.eq.f32.partialorder %v451_v14, 0.0 }
 0x1af   :  { %v637_v42 = vrot.slane %v636_v29, 1  ;;  %v642_v43 = vrot.slane %v641_v31, 2  ;;  %v609_v44 = vadd.f32 %v601_v28, %v593_v33  ;;  %v586_v52 = vmul.f32 %v542_v38, %v1611_v63 }
 0x1b1   :  { %v638_v56 = vmax.f32 %v636_v29, %v637_v42  ;;  %v643_v62 = vmax.f32 %v641_v31, %v642_v43  ;;  %v1627_v2 = vsel %vm617_vm3, -1e+09, %v609_v44  ;;  %v594_v5 = vadd.f32 %v586_v52, %v578_v32 }
 0x1b2   :  { %v646_v60 = vsel %vm631_vm1, %v1627_v2, -inf  ;;  %v570_v12 = vpop.xlane.xlu1 %569  ;;  %v520_v18 = vpop.xlane.xlu0 %519  ;;  %v452_v29 = vadd.f32 %v1637_v6, %v1642_v17 }
 0x1b3   :  { %v688_v19 = vsub.f32 %v623_v54, %v638_v56  ;;  %v644_v22 = vrot.slane %v643_v62, 1  ;;  %v647_v27 = vrot.slane %v646_v60, 4  ;;  %v610_v28 = vadd.f32 %v602_v55, %v594_v5  ;;  %v1654_v54 = vld [vmem:[%s1813_s3 + $0x30] sm:$0xff] }
 0x1b4   :  { %v579_v42 = vmul.f32 %v520_v18, %v451_v14  ;;  %v1659_v55 = vld [vmem:[%s1814_s4 + $0x30] sm:$0xff]  ;;  %vm620_vm6 = vcmp.eq.f32.partialorder %v452_v29, 0.0 }
 0x1b5   :  { %v696_v31 = vmul.f32 1.442695, %v688_v19  ;;  %v645_v32 = vmax.f32 %v643_v62, %v644_v22  ;;  %v648_v33 = vmax.f32 %v646_v60, %v647_v27  ;;  %v626_v38 = vsel %vm618_vm4, -1e+09, %v610_v28 }
 0x1b6   :  { %v653_v11 = vsel %vm631_vm1, %v626_v38, -inf  ;;  %v522_v43 = vpop.xlane.xlu1 %521  ;;  %v544_v44 = vpop.xlane.xlu0 %543  ;;  %v604_v19 = vmul.f32 %v570_v12, %v1637_v6  ;;  %v453_v28 = vadd.f32 %v1659_v55, %v1654_v54 }
 0x1b7   :  { %1186 = vpow2.f32 %v696_v31  ;;  %v689_v52 = vsub.f32 %v624_v9, %v645_v32  ;;  %v649_v50 = vrot.slane %v648_v33, 2  ;;  %v654_v58 = vrot.slane %v653_v11, 4  ;;  %v1669_v32 = vld [vmem:[%s1813_s3 + $0x38] sm:$0xff] }
 0x1b8   :  { %v587_v56 = vmul.f32 %v544_v44, %v1624_v39  ;;  %v580_v18 = vmul.f32 %v522_v43, %v452_v29  ;;  %v603_v9 = vmul.f32 %v568_v40, %v1632_v3  ;;  %vm621_vm7 = vcmp.eq.f32.partialorder %v453_v28, 0.0 }
 0x1b9   :  { %v698_v62 = vmul.f32 1.442695, %v689_v52  ;;  %v650_v5 = vmax.f32 %v648_v33, %v649_v50  ;;  %v655_v60 = vmax.f32 %v653_v11, %v654_v58  ;;  %v1674_v50 = vld [vmem:[%s1814_s4 + $0x38] sm:$0xff] }
 0x1ba   :  { %v595_v22 = vadd.f32 %v587_v56, %v579_v42  ;;  %v546_v27 = vpop.xlane.xlu1 %545  ;;  %v524_v31 = vpop.xlane.xlu0 %523  ;;  %v454_v44 = vadd.f32 %v1674_v50, %v1669_v32 }
 0x1bb   :  { %1188 = vpow2.f32 %v698_v62  ;;  %v651_v58 = vrot.slane %v650_v5, 1  ;;  %v656_v40 = vrot.slane %v655_v60, 2  ;;  %v588_v12 = vmul.f32 %v546_v27, %v1642_v17 }
 0x1bc   :  { %v611_v33 = vadd.f32 %v603_v9, %v595_v22  ;;  %v581_v56 = vmul.f32 %v524_v31, %v453_v28  ;;  %vm622_vm8 = vcmp.eq.f32.partialorder %v454_v44, 0.0 }
 0x1bd   :  { %v652_v11 = vmax.f32 %v650_v5, %v651_v58  ;;  %v657_v42 = vmax.f32 %v655_v60, %v656_v40  ;;  %v596_v43 = vadd.f32 %v588_v12, %v580_v18 }
 0x1be   :  { %v627_v52 = vsel %vm619_vm5, -1e+09, %v611_v33  ;;  %v526_v4 = vpop.xlane.xlu1 %525  ;;  %v548_v51 = vpop.xlane.xlu0 %547 }
 0x1bf   :  { %v690_v7 = vsub.f32 %v1627_v2, %v652_v11  ;;  %v658_v62 = vrot.slane %v657_v42, 1  ;;  %v660_v47 = vsel %vm631_vm1, %v627_v52, -inf  ;;  %v612_v0 = vadd.f32 %v604_v19, %v596_v43 }
 0x1c0   :  { %v661_v27 = vrot.slane %v660_v47, 4  ;;  %v589_v5 = vmul.f32 %v548_v51, %v1654_v54  ;;  %v582_v22 = vmul.f32 %v526_v4, %v454_v44 }
 0x1c1   :  { %v700_v60 = vmul.f32 1.442695, %v690_v7  ;;  %v659_v18 = vmax.f32 %v657_v42, %v658_v62  ;;  %v628_v9 = vsel %vm620_vm6, -1e+09, %v612_v0 }
 0x1c2   :  { %v662_v58 = vmax.f32 %v660_v47, %v661_v27  ;;  %v667_v14 = vsel %vm631_vm1, %v628_v9, -inf  ;;  %v597_v29 = vadd.f32 %v589_v5, %v581_v56  ;;  %v550_v31 = vpop.xlane.xlu1 %549  ;;  %v572_v40 = vpop.xlane.xlu0 %571 }
 0x1c3   :  { %1190 = vpow2.f32 %v700_v60  ;;  %v691_v12 = vsub.f32 %v626_v38, %v659_v18  ;;  %v668_v2 = vrot.slane %v667_v14, 4  ;;  %v590_v33 = vmul.f32 %v550_v31, %v1669_v32 }
 0x1c4   :  { %v1685_v11 = vpop.eup %1186  ;;  %v663_v19 = vrot.slane %v662_v58, 2  ;;  %v605_v51 = vmul.f32 %v572_v40, %v1659_v55 }
 0x1c5   :  { %v702_v7 = vmul.f32 1.442695, %v691_v12  ;;  %v669_v0 = vmax.f32 %v667_v14, %v668_v2  ;;  %v598_v4 = vadd.f32 %v590_v33, %v582_v22  ;;  %v712_v47 = vsel %vm631_vm1, %v1685_v11, 0.0 }
 0x1c6   :  { %v664_v42 = vmax.f32 %v662_v58, %v663_v19  ;;  %v613_v43 = vadd.f32 %v605_v51, %v597_v29  ;;  %v574_v56 = vpop.xlane.xlu1 %573  ;;  %v713_v62 = vrot.slane %v712_v47, 4 }
 0x1c7   :  { %1192 = vpow2.f32 %v702_v7  ;;  %v670_v38 = vrot.slane %v669_v0, 2  ;;  %v606_v27 = vmul.f32 %v574_v56, %v1674_v50 }
 0x1c8   :  { %v1691_v5 = vpop.eup %1188  ;;  %v665_v60 = vrot.slane %v664_v42, 1  ;;  %v629_v18 = vsel %vm621_vm7, -1e+09, %v613_v43  ;;  %v714_v31 = vadd.f32 %v713_v62, %v712_v47 }
 0x1c9   :  { %v671_v14 = vmax.f32 %v669_v0, %v670_v38  ;;  %v674_v22 = vsel %vm631_vm1, %v629_v18, -inf  ;;  %v614_v40 = vadd.f32 %v606_v27, %v598_v4  ;;  %v719_v58 = vsel %vm631_vm1, %v1691_v5, 0.0 }
 0x1ca   :  { %v666_v29 = vmax.f32 %v664_v42, %v665_v60  ;;  %v675_v12 = vrot.slane %v674_v22, 4  ;;  %v715_v2 = vrot.slane %v714_v31, 2  ;;  %v720_v33 = vrot.slane %v719_v58, 4 }
 0x1cb   :  { %v672_v19 = vrot.slane %v671_v14, 1  ;;  %v630_v51 = vsel %vm622_vm8, -1e+09, %v614_v40 }
 0x1cc   :  { %v692_v7 = vsub.f32 %v627_v52, %v666_v29  ;;  %v676_v56 = vmax.f32 %v674_v22, %v675_v12  ;;  %v681_v44 = vsel %vm631_vm1, %v630_v51, -inf  ;;  %v716_v28 = vadd.f32 %v715_v2, %v714_v31 }
 0x1cd   :  { %v673_v43 = vmax.f32 %v671_v14, %v672_v19  ;;  %v682_v47 = vrot.slane %v681_v44, 4  ;;  %v721_v0 = vadd.f32 %v720_v33, %v719_v58 }
 0x1ce   :  { %v704_v62 = vmul.f32 1.442695, %v692_v7  ;;  %v677_v38 = vrot.slane %v676_v56, 2  ;;  %v717_v4 = vrot.slane %v716_v28, 1 }
 0x1cf   :  { %v693_v27 = vsub.f32 %v628_v9, %v673_v43  ;;  %v683_v20 = vmax.f32 %v681_v44, %v682_v47  ;;  %v722_v26 = vrot.slane %v721_v0, 2 }
 0x1d0   :  { %v1698_v42 = vpop.eup %1190  ;;  %1194 = vpow2.f32 %v704_v62  ;;  %v678_v60 = vmax.f32 %v676_v56, %v677_v38  ;;  %v718_v37 = vadd.f32 %v717_v4, %v716_v28 }
 0x1d1   :  { %v706_v40 = vmul.f32 1.442695, %v693_v27  ;;  %v684_v52 = vrot.slane %v683_v20, 2  ;;  %v723_v22 = vadd.f32 %v722_v26, %v721_v0  ;;  %v726_v31 = vsel %vm631_vm1, %v1698_v42, 0.0 }
 0x1d2   :  { %v679_v14 = vrot.slane %v678_v60, 1  ;;  %1196 = vrcp.f32 %v718_v37  ;;  %v727_v58 = vrot.slane %v726_v31, 4 }
 0x1d3   :  { %1198 = vpow2.f32 %v706_v40  ;;  %v685_v29 = vmax.f32 %v683_v20, %v684_v52  ;;  %v724_v12 = vrot.slane %v723_v22, 1 }
 0x1d4   :  { %v1702_v9 = vpop.eup %1192  ;;  %v680_v2 = vmax.f32 %v678_v60, %v679_v14  ;;  %v728_v33 = vadd.f32 %v727_v58, %v726_v31 }
 0x1d5   :  { %v686_v19 = vrot.slane %v685_v29, 1  ;;  %v725_v7 = vadd.f32 %v724_v12, %v723_v22  ;;  %v733_v56 = vsel %vm631_vm1, %v1702_v9, 0.0 }
 0x1d6   :  { %v694_v44 = vsub.f32 %v629_v18, %v680_v2  ;;  %v729_v26 = vrot.slane %v728_v33, 2  ;;  %v734_v28 = vrot.slane %v733_v56, 4 }
 0x1d7   :  { %v687_v43 = vmax.f32 %v685_v29, %v686_v19  ;;  %1200 = vrcp.f32 %v725_v7 }
 0x1d8   :  { %v708_v47 = vmul.f32 1.442695, %v694_v44  ;;  %v730_v0 = vadd.f32 %v729_v26, %v728_v33  ;;  %v735_v62 = vadd.f32 %v734_v28, %v733_v56 }
 0x1d9   :  { %v695_v38 = vsub.f32 %v630_v51, %v687_v43 }
 0x1da   :  { %1202 = vpow2.f32 %v708_v47  ;;  %v731_v20 = vrot.slane %v730_v0, 1  ;;  %v736_v4 = vrot.slane %v735_v62, 2 }
 0x1db   :  { %v710_v27 = vmul.f32 1.442695, %v695_v38 }
 0x1dc   :  { %v732_v60 = vadd.f32 %v731_v20, %v730_v0  ;;  %v737_v40 = vadd.f32 %v736_v4, %v735_v62 }
 0x1dd   :  { %v1706_v52 = vpop.eup %1194  ;;  %1204 = vpow2.f32 %v710_v27 }
 0x1de   :  { %1206 = vrcp.f32 %v732_v60  ;;  %v738_v22 = vrot.slane %v737_v40, 1  ;;  %v740_v18 = vsel %vm631_vm1, %v1706_v52, 0.0 }
 0x1df   :  { %v1197_v31 = vpop.eup %1196  ;;  %v741_v14 = vrot.slane %v740_v18, 4 }
 0x1e0   :  { %v1710_v58 = vpop.eup %1198  ;;  %v776_v29 = vmul.f32 %v1197_v31, %v718_v37  ;;  %v739_v51 = vadd.f32 %v738_v22, %v737_v40 }
 0x1e1   :  { %v747_v12 = vsel %vm631_vm1, %v1710_v58, 0.0  ;;  %v742_v2 = vadd.f32 %v741_v14, %v740_v18 }
 0x1e2   :  { %v784_v33 = vsub.f32 2.0, %v776_v29  ;;  %1208 = vrcp.f32 %v739_v51  ;;  %v748_v19 = vrot.slane %v747_v12, 4 }
 0x1e3   :  { %v743_v56 = vrot.slane %v742_v2, 2 }
 0x1e4   :  { %v1201_v44 = vpop.eup %1200  ;;  %v792_v26 = vmul.f32 %v1197_v31, %v784_v33  ;;  %v749_v28 = vadd.f32 %v748_v19, %v747_v12 }
 0x1e5   :  { %v777_v43 = vmul.f32 %v1201_v44, %v725_v7  ;;  %v744_v47 = vadd.f32 %v743_v56, %v742_v2 }
 0x1e6   :  { %v800_v0 = vmul.f32 %v1685_v11, %v792_v26  ;;  %v750_v62 = vrot.slane %v749_v28, 2 }
 0x1e7   :  { %v1715_v38 = vpop.eup %1202  ;;  %v785_v37 = vsub.f32 2.0, %v777_v43  ;;  %v745_v20 = vrot.slane %v744_v47, 1 }
 0x1e8   :  { %v816_v4 = vmul.f32 %v800_v0, %v1567_v15  ;;  %808 = vst.msk [vmem:[%s1819_s9] sm:$0xff] %vm631_vm1, %v800_v0  ;;  %v824_v27 = vmul.f32 %v800_v0, %v1572_v16  ;;  %v751_v40 = vadd.f32 %v750_v62, %v749_v28  ;;  %v754_v7 = vsel %vm631_vm1, %v1715_v38, 0.0 }
 0x1e9   :  { %v793_v22 = vmul.f32 %v1201_v44, %v785_v37  ;;  %v746_v11 = vadd.f32 %v745_v20, %v744_v47  ;;  %v755_v18 = vrot.slane %v754_v7, 4 }
 0x1ea   :  { %v1725_v31 = vpop.eup %1204  ;;  %946 = vperm.xlu1 %1184, %v816_v4   ;;  %v832_v14 = vadd.f32 %v824_v27, %v816_v4  ;;  %v752_v29 = vrot.slane %v751_v40, 1 }
 0x1eb   :  { %v1207_v15 = vpop.eup %1206  ;;  %v801_v12 = vmul.f32 %v1691_v5, %v793_v22  ;;  %1210 = vrcp.f32 %v746_v11  ;;  %v761_v2 = vsel %vm631_vm1, %v1725_v31, 0.0  ;;  %v756_v16 = vadd.f32 %v755_v18, %v754_v7 }
 0x1ec   :  { %898 = vperm.xlu0 %1185, %v832_v14   ;;  %v778_v33 = vmul.f32 %v1207_v15, %v732_v60  ;;  %v753_v19 = vadd.f32 %v752_v29, %v751_v40  ;;  %v762_v56 = vrot.slane %v761_v2, 4 }
 0x1ed   :  { %v817_v44 = vmul.f32 %v801_v12, %v1584_v25  ;;  %809 = vst.msk [vmem:[%s1819_s9 + $0x8] sm:$0xff] %vm631_vm1, %v801_v12  ;;  %v825_v26 = vmul.f32 %v801_v12, %v1579_v24  ;;  %v757_v28 = vrot.slane %v756_v16, 2 }
 0x1ee   :  { %1002 = vperm.xlu1 %1184, %v824_v27   ;;  %v786_v5 = vsub.f32 2.0, %v778_v33  ;;  %1212 = vrcp.f32 %v753_v19  ;;  %v763_v43 = vadd.f32 %v762_v56, %v761_v2 }
 0x1ef   :  { %v1209_v47 = vpop.eup %1208  ;;  %v758_v0 = vadd.f32 %v757_v28, %v756_v16  ;;  %v833_v60 = vadd.f32 %v825_v26, %v817_v44 }
 0x1f0   :  { %951 = vperm.xlu0 %1185, %v817_v44   ;;  %v794_v62 = vmul.f32 %v1207_v15, %v786_v5  ;;  %v779_v37 = vmul.f32 %v1209_v47, %v739_v51  ;;  %v764_v20 = vrot.slane %v763_v43, 2 }
 0x1f1   :  { %v759_v25 = vrot.slane %v758_v0, 1 }
 0x1f2   :  { %903 = vperm.xlu1 %1184, %v833_v60   ;;  %v802_v4 = vmul.f32 %v1698_v42, %v794_v62  ;;  %v787_v40 = vsub.f32 2.0, %v779_v37  ;;  %v765_v7 = vadd.f32 %v764_v20, %v763_v43 }
 0x1f3   :  { %v760_v22 = vadd.f32 %v759_v25, %v758_v0 }
 0x1f4   :  { %1007 = vperm.xlu0 %1185, %v825_v26   ;;  %v818_v24 = vmul.f32 %v802_v4, %v1594_v45  ;;  %810 = vst.msk [vmem:[%s1819_s9 + $0x10] sm:$0xff] %vm631_vm1, %v802_v4  ;;  %v795_v27 = vmul.f32 %v1209_v47, %v787_v40  ;;  %v766_v18 = vrot.slane %v765_v7, 1  ;;  %v826_v42 = vmul.f32 %v802_v4, %v1599_v46 }
 0x1f5   :  { %1214 = vrcp.f32 %v760_v22 }
 0x1f6   :  { %956 = vperm.xlu1 %1184, %v818_v24   ;;  %v803_v51 = vmul.f32 %v1702_v9, %v795_v27  ;;  %v767_v14 = vadd.f32 %v766_v18, %v765_v7  ;;  %v834_v9 = vadd.f32 %v826_v42, %v818_v24 }
 0x1f8   :  { %v1211_v29 = vpop.eup %1210  ;;  %811 = vst.msk [vmem:[%s1819_s9 + $0x18] sm:$0xff] %vm631_vm1, %v803_v51  ;;  %v819_v45 = vmul.f32 %v803_v51, %v1611_v63  ;;  %1216 = vrcp.f32 %v767_v14  ;;  %v827_v16 = vmul.f32 %v803_v51, %v1606_v57 }
 0x1f9   :  { %v780_v15 = vmul.f32 %v1211_v29, %v746_v11 }
 0x1fa   :  { %961 = vperm.xlu0 %1185, %v819_v45   ;;  %1012 = vperm.xlu1 %1184, %v826_v42   ;;  %v835_v28 = vadd.f32 %v827_v16, %v819_v45 }
 0x1fb   :  { %v1213_v12 = vpop.eup %1212  ;;  %v788_v2 = vsub.f32 2.0, %v780_v15 }
 0x1fc   :  { %v781_v33 = vmul.f32 %v1213_v12, %v753_v19 }
 0x1fd   :  { %v796_v56 = vmul.f32 %v1211_v29, %v788_v2 }
 0x1fe   :  { %1017 = vperm.xlu0 %1185, %v827_v16   ;;  %908 = vperm.xlu1 %1184, %v834_v9   ;;  %v789_v44 = vsub.f32 2.0, %v781_v33 }
 0x1ff   :  { %v804_v26 = vmul.f32 %v1706_v52, %v796_v56 }
 0x200   :  { %v797_v63 = vmul.f32 %v1213_v12, %v789_v44 }
 0x201   :  { %812 = vst.msk [vmem:[%s1819_s9 + $0x20] sm:$0xff] %vm631_vm1, %v804_v26  ;;  %v820_v52 = vmul.f32 %v804_v26, %v1624_v39 }
 0x202   :  { %v1215_v46 = vpop.eup %1214  ;;  %913 = vperm.xlu1 %1184, %v835_v28   ;;  %v805_v11 = vmul.f32 %v1710_v58, %v797_v63  ;;  %v828_v58 = vmul.f32 %v804_v26, %v1632_v3 }
 0x203   :  { %v782_v57 = vmul.f32 %v1215_v46, %v760_v22 }
 0x204   :  { %813 = vst.msk [vmem:[%s1819_s9 + $0x28] sm:$0xff] %vm631_vm1, %v805_v11  ;;  %v821_v19 = vmul.f32 %v805_v11, %v1642_v17  ;;  %v829_v60 = vmul.f32 %v805_v11, %v1637_v6  ;;  %v836_v39 = vadd.f32 %v828_v58, %v820_v52 }
 0x205   :  { %v1217_v5 = vpop.eup %1216  ;;  %v790_v43 = vsub.f32 2.0, %v782_v57 }
 0x206   :  { %971 = vperm.xlu0 %1185, %v821_v19   ;;  %966 = vperm.xlu1 %1184, %v820_v52   ;;  %v783_v47 = vmul.f32 %v1217_v5, %v767_v14  ;;  %v837_v6 = vadd.f32 %v829_v60, %v821_v19 }
 0x207   :  { %v798_v0 = vmul.f32 %v1215_v46, %v790_v43 }
 0x208   :  { %v791_v62 = vsub.f32 2.0, %v783_v47 }
 0x209   :  { %v806_v37 = vmul.f32 %v1715_v38, %v798_v0 }
 0x20a   :  { %1027 = vperm.xlu0 %1185, %v829_v60   ;;  %1022 = vperm.xlu1 %1184, %v828_v58   ;;  %v799_v20 = vmul.f32 %v1217_v5, %v791_v62  ;;  %v1839_v60 = vld [vmem:[#allocation14_spill] sm:$0xff] }
 0x20b   :  { %814 = vst.msk [vmem:[%s1819_s9 + $0x30] sm:$0xff] %vm631_vm1, %v806_v37  ;;  %v822_v25 = vmul.f32 %v806_v37, %v1654_v54  ;;  %v830_v4 = vmul.f32 %v806_v37, %v1659_v55  ;;  %v251_v37 = vpop.f32.mrf.mxu0 }
 0x20c   :  { %v807_v17 = vmul.f32 %v1725_v31, %v799_v20 }
 0x20d   :  { %v838_v31 = vadd.f32 %v830_v4, %v822_v25 }
 0x20e   :  { %918 = vperm.xlu1 %1184, %v836_v39   ;;  %815 = vst.msk [vmem:[%s1819_s9 + $0x38] sm:$0xff] %vm631_vm1, %v807_v17  ;;  %v823_v3 = vmul.f32 %v807_v17, %v1669_v32  ;;  %v831_v38 = vmul.f32 %v807_v17, %v1674_v50  ;;  %v1840_v17 = vld [vmem:[#allocation13_spill] sm:$0xff]  ;;  %s1313_s9 = smov [#allocation8]  }
 0x20f   :  { %s1069_s1 = sshll.u32 %s1313_s9, 4  ;;  %s1070_s1 = int_to_ptr.vmem [resolvable:$true] %s1069_s1 }
 0x210   :  { %981 = vperm.xlu0 %1185, %v823_v3   ;;  %v839_v40 = vadd.f32 %v831_v38, %v823_v3  ;;  %v1842_v3 = vld [vmem:[#allocation16_spill] sm:$0xff]  ;;  %s1278_s7 = scalar_lea.vmem %s1070_s1, 1024  ;;  %p1283_p2 = scmp.lt.s32.totalorder %s1070_s1, %s1070_s1 }
 0x211   :  { %p1279_p1 = scmp.ne.s32.totalorder %s1070_s1, %s1278_s7  ;;  %p1284_p3 = scmp.lt.s32.totalorder %s1278_s7, %s1278_s7 }
 0x212   :  { %923 = vperm.xlu1 %1184, %v837_v6  }
 0x213   :  { %p1285_p4 = por %p1284_p3, %p1283_p2 }
 0x214   :  { %1037 = vperm.xlu0 %1185, %v831_v38  }
 0x215   :  { %p1286_p5 = pnand %p1285_p4, %p1279_p1 }
 0x216   :  { %976 = vperm.xlu1 %1184, %v822_v25  }
 0x21a   :  { %928 = vperm.xlu1 %1184, %v838_v31   ;;  %v1843_v31 = vld [vmem:[#allocation21_spill] sm:$0xff] }
 0x21e   :  { %933 = vperm.xlu1 %1184, %v839_v40  }
 0x222   :  { %1032 = vperm.xlu1 %1184, %v830_v4  }
 0x265   :  { %v947_v7 = vpop.permute.xlu1 %946 }
 0x266   :  { %v984_v32 = vmul.f32 %v947_v7, %v1462_v30  ;;  %v1844_v7 = vld [vmem:[#allocation18_spill] sm:$0xff] }
 0x267   :  { %v899_v22 = vpop.permute.xlu0 %898 }
 0x268   :  { %v936_v24 = vmul.f32 %v899_v22, %v1469_v36 }
 0x269   :  { %v1003_v27 = vpop.permute.xlu1 %1002 }
 0x26a   :  { %v992_v18 = vadd.f32 %v984_v32, %v936_v24  ;;  %v1040_v50 = vmul.f32 %v1453_v23, %v1003_v27  ;;  %v1845_v24 = vld [vmem:[#allocation20_spill] sm:$0xff] }
 0x26b   :  { %v952_v51 = vpop.permute.xlu0 %951 }
 0x26c   :  { %v1048_v54 = vadd.f32 %v1040_v50, %v992_v18  ;;  %v985_v55 = vmul.f32 %v952_v51, %v1474_v41  ;;  %v1846_v18 = vld [vmem:[#allocation19_spill] sm:$0xff] }
 0x26d   :  { %v904_v14 = vpop.permute.xlu1 %903 }
 0x26e   :  { %1056 = vst [vmem:[#allocation8] sm:$0xff] %v1048_v54  ;;  %v937_v29 = vmul.f32 %v904_v14, %v1482_v49 }
 0x26f   :  { %v1008_v45 = vpop.permute.xlu0 %1007 }
 0x270   :  { %v993_v42 = vadd.f32 %v985_v55, %v937_v29  ;;  %v1041_v15 = vmul.f32 %v1464_v34, %v1008_v45  ;;  %v1847_v29 = vld [vmem:[#allocation17_spill] sm:$0xff] }
 0x271   :  { %v957_v12 = vpop.permute.xlu1 %956 }
 0x272   :  { %v1049_v30 = vadd.f32 %v1041_v15, %v993_v42  ;;  %v986_v23 = vmul.f32 %v957_v12, %v1486_v53 }
 0x274   :  { %1057 = vst [vmem:[#allocation8 + $0x8] sm:$0xff] %v1049_v30 }
 0x275   :  { %v1013_v36 = vpop.permute.xlu1 %1012  ;;  %v962_v2 = vpop.permute.xlu0 %961 }
 0x276   :  { %v1042_v33 = vmul.f32 %v1480_v48, %v1013_v36  ;;  %v987_v49 = vmul.f32 %v962_v2, %v1498_v1 }
 0x279   :  { %v909_v16 = vpop.permute.xlu1 %908  ;;  %v1018_v41 = vpop.permute.xlu0 %1017 }
 0x27a   :  { %v938_v9 = vmul.f32 %v909_v16, %v1495_v61  ;;  %v1043_v28 = vmul.f32 %v1490_v59, %v1018_v41  ;;  %v1838_v59 = vld [vmem:[#allocation15_spill] sm:$0xff] }
 0x27c   :  { %v994_v56 = vadd.f32 %v986_v23, %v938_v9 }
 0x27d   :  { %v914_v44 = vpop.permute.xlu1 %913 }
 0x27e   :  { %v1050_v26 = vadd.f32 %v1042_v33, %v994_v56  ;;  %v939_v34 = vmul.f32 %v914_v44, %v1509_v10 }
 0x280   :  { %1058 = vst [vmem:[#allocation8 + $0x10] sm:$0xff] %v1050_v26  ;;  %v995_v63 = vadd.f32 %v987_v49, %v939_v34 }
 0x281   :  { %v967_v46 = vpop.permute.xlu1 %966  ;;  %v972_v57 = vpop.permute.xlu0 %971 }
 0x282   :  { %v1051_v11 = vadd.f32 %v1043_v28, %v995_v63  ;;  %v988_v48 = vmul.f32 %v967_v46, %v1512_v13  ;;  %v989_v10 = vmul.f32 %v972_v57, %v1529_v35 }
 0x284   :  { %1059 = vst [vmem:[#allocation8 + $0x18] sm:$0xff] %v1051_v11 }
 0x285   :  { %v1023_v53 = vpop.permute.xlu1 %1022  ;;  %v1028_v5 = vpop.permute.xlu0 %1027 }
 0x286   :  { %v1044_v52 = vmul.f32 %v1504_v8, %v1023_v53  ;;  %v1045_v58 = vmul.f32 %v1839_v60, %v1028_v5  ;;  %v1841_v8 = vld [vmem:[#allocation12_spill] sm:$0xff] }
 0x287   :  { %v879_v6 = vrot.slane %v1842_v3, %v1841_v8 }
 0x289   :  { %v919_v61 = vpop.permute.xlu1 %918 }
 0x28a   :  { %v940_v19 = vmul.f32 %v919_v61, %v1516_v21  ;;  %v252_v21 = vadd.f32 %v251_v37, %v1840_v17 }
 0x28b   :  { %v982_v13 = vpop.permute.xlu0 %981 }
 0x28c   :  { %v996_v1 = vadd.f32 %v988_v48, %v940_v19  ;;  %v895_v25 = vadd.f32 %v879_v6, %v252_v21  ;;  %v991_v40 = vmul.f32 %v982_v13, %v1843_v31 }
 0x28d   :  { %v924_v43 = vpop.permute.xlu1 %923 }
 0x28e   :  { %v1052_v47 = vadd.f32 %v1044_v52, %v996_v1  ;;  %v941_v0 = vmul.f32 %v924_v43, %v1838_v59 }
 0x28f   :  { %v1038_v35 = vpop.permute.xlu0 %1037 }
 0x290   :  { %1060 = vst [vmem:[#allocation8 + $0x20] sm:$0xff] %v1052_v47  ;;  %v997_v62 = vadd.f32 %v989_v10, %v941_v0  ;;  %v1047_v27 = vmul.f32 %v1845_v24, %v1038_v35 }
 0x291   :  { %v977_v20 = vpop.permute.xlu1 %976 }
 0x292   :  { %v1053_v39 = vadd.f32 %v1045_v58, %v997_v62  ;;  %v990_v50 = vmul.f32 %v977_v20, %v1846_v18 }
 0x294   :  { %1061 = vst [vmem:[#allocation8 + $0x28] sm:$0xff] %v1053_v39 }
 0x295   :  { %v929_v38 = vpop.permute.xlu1 %928 }
 0x296   :  { %v942_v22 = vmul.f32 %v929_v38, %v1844_v7 }
 0x298   :  { %v998_v14 = vadd.f32 %v990_v50, %v942_v22 }
 0x299   :  { %v934_v4 = vpop.permute.xlu1 %933 }
 0x29a   :  { %v943_v32 = vmul.f32 %v934_v4, %v895_v25 }
 0x29c   :  { %v999_v51 = vadd.f32 %v991_v40, %v943_v32 }
 0x29d   :  { %v1033_v54 = vpop.permute.xlu1 %1032 }
 0x29e   :  { %v1055_v55 = vadd.f32 %v1047_v27, %v999_v51  ;;  %v1046_v45 = vmul.f32 %v1847_v29, %v1033_v54 }
 0x2a0   :  { %1063 = vst [vmem:[#allocation8 + $0x38] sm:$0xff] %v1055_v55  ;;  %v1054_v42 = vadd.f32 %v1046_v45, %v998_v14 }
 0x2a2   :  { %1062 = vst [vmem:[#allocation8 + $0x30] sm:$0xff] %v1054_v42 }
 0x2a3   :  { %1289 = shalt.err (!%p1286_p5)
}
 0x2a4   :  { %1075 = dma.vmem_to_hbm [thread:$0]  %s1070_s1, 1024, %s1818_s8, [#allocation4], %s1308_s19, %s1308_s19, %s1309_s20  }
 0x2a5   :  { %1302 = dma.done.wait [#allocation4], 1024  }
 0x2a6   :  { %1303 = vsyncadd [#allocation4], 4294966272 }
 0x2a7   :  { %1083 = vsyncpa [#allocation3], 1 }
 0x2a8   :  { %1084 = vsyncpa [#allocation6], 1 }
 0x2a9   :  { %1085 = vsyncpa [#allocation4], 1 }

</bundles_post_ra>
